<compile_context>
chip_gen: v7x
topology: tpu7x:2x2x1
jax: 0.10.0
libtpu: 0.0.40
codegen_flags: <defaults>
</compile_context>

<pallas_src>
import jax
import jax.numpy as jnp
from jax.experimental import pallas as pl
from jax.experimental.pallas import tpu as pltpu


HIDDEN = 768          # BERT pooled-output dim (fixed by the module)
FC1_OUT = 256
FC2_OUT = 64
DEFAULT_TILE_B = 512  # batch tile (multiple of 16 for bf16 sublane packing)


def _round_up(x, m):
    return ((x + m - 1) // m) * m


def ranking_head_kernel(q_ref, d_ref, w1q_ref, w1d_ref, b1_ref, w2_ref, b2_ref,
                        w3_ref, b3_ref, out_ref):
    """One batch tile of the MLP ranking head.

    q_ref, d_ref : (TB, 768) bf16   pooled query / doc embeddings (streamed)
    w1q_ref, w1d_ref : (768, 256) bf16   fc1 weight split along K (resident)
    b1_ref : (1, 256) f32
    w2_ref : (256, 64) bf16,  b2_ref : (1, 64) f32
    w3_ref : (1, 64) f32     fc3 weight as a row (VPU path)
    b3_ref : (1, 1) f32 in SMEM
    out_ref: (1, TB) f32     lane-dense scores row
    """
    # fc1 over the (virtual) concat [q, d]: two K=768 dots into one f32 acc.
    h1 = jnp.dot(q_ref[...], w1q_ref[...], preferred_element_type=jnp.float32)
    h1 = h1 + jnp.dot(d_ref[...], w1d_ref[...], preferred_element_type=jnp.float32)
    h1 = jnp.maximum(h1 + b1_ref[...], 0.0)                       # ReLU

    # fc2 (256 -> 64) on the MXU.
    h2 = (jnp.dot(h1.astype(jnp.bfloat16), w2_ref[...],
                  preferred_element_type=jnp.float32) + b2_ref[...])
    h2 = jnp.maximum(h2, 0.0)                                      # ReLU

    # fc3 (64 -> 1): VPU multiply + XLU lane reduction; result laid out along
    # lanes so the output block is lane-dense.
    scores = jnp.sum(h2 * w3_ref[...], axis=-1) + b3_ref[0, 0]     # (TB,)
    out_ref[...] = scores.reshape(1, -1).astype(out_ref.dtype)     # (1, TB)


def bert_ranking_head(query_pooled, doc_pooled, params, tile_b=DEFAULT_TILE_B):
    """Returns scores of shape (B,) (matching x.squeeze(-1))."""
    w1q, w1d, b1, w2, b2, w3_row, b3 = params
    B = query_pooled.shape[0]

    # Activations shipped as bf16 (no concat, no HBM round trip of a fused op).
    q = query_pooled.astype(jnp.bfloat16)
    d = doc_pooled.astype(jnp.bfloat16)

    # Batch tiling: bf16 needs tb % 16 == 0 (or tb == padded batch).
    tb = min(tile_b, _round_up(B, 16))
    bp = _round_up(B, tb)
    if bp != B:
        pad = ((0, bp - B), (0, 0))
        q = jnp.pad(q, pad)
        d = jnp.pad(d, pad)
    n_tiles = bp // tb

    const = lambda i: (0, 0)   # same block every step -> weights stay resident

    flops = 2 * bp * (2 * HIDDEN * FC1_OUT + FC1_OUT * FC2_OUT + FC2_OUT)
    bytes_accessed = (q.size * 2 + d.size * 2                         # bf16 activations
                      + (w1q.size + w1d.size + w2.size) * 2           # bf16 weights (once)
                      + (b1.size + b2.size + w3_row.size + b3.size) * 4
                      + bp * 4)                                       # scores out

    out = pl.pallas_call(
        ranking_head_kernel,
        out_shape=jax.ShapeDtypeStruct((1, bp), jnp.float32),
        grid=(n_tiles,),
        in_specs=[
            pl.BlockSpec((tb, HIDDEN), lambda i: (i, 0)),        # q tile (streamed)
            pl.BlockSpec((tb, HIDDEN), lambda i: (i, 0)),        # d tile (streamed)
            pl.BlockSpec((HIDDEN, FC1_OUT), const),              # fc1 weight (query half)
            pl.BlockSpec((HIDDEN, FC1_OUT), const),              # fc1 weight (doc half)
            pl.BlockSpec((1, FC1_OUT), const),                   # fc1 bias
            pl.BlockSpec((FC1_OUT, FC2_OUT), const),             # fc2 weight
            pl.BlockSpec((1, FC2_OUT), const),                   # fc2 bias
            pl.BlockSpec((1, FC2_OUT), const),                   # fc3 weight row
            pl.BlockSpec(memory_space=pltpu.MemorySpace.SMEM),   # fc3 bias scalar
        ],
        out_specs=pl.BlockSpec((1, tb), lambda i: (0, i)),       # lane-dense scores
        compiler_params=pltpu.CompilerParams(
            dimension_semantics=("parallel",),   # batch grid shards across TCs on v7x
        ),
        cost_estimate=pl.CostEstimate(
            flops=flops, transcendentals=0, bytes_accessed=bytes_accessed),
    )(q, d, w1q, w1d, b1, w2, b2, w3_row, b3)

    return out[0, :B]   # drop batch padding; already squeezed


def init_params(key):
    """Deterministic synthetic parameters with the module's fc shapes."""
    k1, k2, k3, k4, k5, k6, k7 = jax.random.split(key, 7)
    # fc1 weight (1536 x 256), stored split along K and in bf16 for the MXU.
    w1q = (jax.random.normal(k1, (HIDDEN, FC1_OUT), jnp.float32) * 0.02).astype(jnp.bfloat16)
    w1d = (jax.random.normal(k2, (HIDDEN, FC1_OUT), jnp.float32) * 0.02).astype(jnp.bfloat16)
    b1 = jax.random.normal(k3, (1, FC1_OUT), jnp.float32) * 0.02
    w2 = (jax.random.normal(k4, (FC1_OUT, FC2_OUT), jnp.float32) * 0.02).astype(jnp.bfloat16)
    b2 = jax.random.normal(k5, (1, FC2_OUT), jnp.float32) * 0.02
    w3_row = jax.random.normal(k6, (1, FC2_OUT), jnp.float32) * 0.02
    b3 = jax.random.normal(k7, (1, 1), jnp.float32) * 0.02
    return (w1q, w1d, b1, w2, b2, w3_row, b3)


def reference_head(query_pooled, doc_pooled, params):
    """Pure-JAX reference performing the same bf16-activation/weight math."""
    w1q, w1d, b1, w2, b2, w3_row, b3 = params
    qb = query_pooled.astype(jnp.bfloat16)
    db = doc_pooled.astype(jnp.bfloat16)
    h = (jnp.dot(qb, w1q, preferred_element_type=jnp.float32)
         + jnp.dot(db, w1d, preferred_element_type=jnp.float32) + b1)
    h = jnp.maximum(h, 0.0)
    h = jnp.dot(h.astype(jnp.bfloat16), w2, preferred_element_type=jnp.float32) + b2
    h = jnp.maximum(h, 0.0)
    return jnp.sum(h * w3_row, axis=-1) + b3[0, 0]


if __name__ == "__main__":
    key = jax.random.PRNGKey(0)
    kq, kd, kp = jax.random.split(key, 3)

    B = 8  # small smoke-test batch of pooled BERT outputs
    query_pooled = jax.random.normal(kq, (B, HIDDEN), jnp.float32)
    doc_pooled = jax.random.normal(kd, (B, HIDDEN), jnp.float32)
    params = init_params(kp)

    out = bert_ranking_head(query_pooled, doc_pooled, params)
    out = jax.block_until_ready(out)

    ref = reference_head(query_pooled, doc_pooled, params)
    assert out.shape == (B,), out.shape
    assert jnp.allclose(out, ref, atol=1e-2, rtol=1e-2), (out, ref)

    print("KERNEL_OK")
</pallas_src>

<mosaic_0001>
module attributes {stable_mosaic.version = 11 : i64} {
  func.func @ranking_head_kernel(%arg0: i32, %arg1: memref<16x768xbf16, #tpu.memory_space<vmem>>, %arg2: memref<16x768xbf16, #tpu.memory_space<vmem>>, %arg3: memref<768x256xbf16, #tpu.memory_space<vmem>>, %arg4: memref<768x256xbf16, #tpu.memory_space<vmem>>, %arg5: memref<1x256xf32, #tpu.memory_space<vmem>>, %arg6: memref<256x64xbf16, #tpu.memory_space<vmem>>, %arg7: memref<1x64xf32, #tpu.memory_space<vmem>>, %arg8: memref<1x64xf32, #tpu.memory_space<vmem>>, %arg9: memref<1x1xf32, #tpu.memory_space<smem>>, %arg10: memref<1x16xf32, #tpu.memory_space<vmem>>) attributes {dimension_semantics = [#tpu.dimension_semantics<parallel>], iteration_bounds = array<i64: 1>, scalar_prefetch = 0 : i64, scratch_operands = 0 : i64, tpu.core_type = #tpu.core_type<tc>, window_params = [{transform_indices = @transform_0, window_bounds = array<i64: 16, 768>}, {transform_indices = @transform_1, window_bounds = array<i64: 16, 768>}, {pipeline_mode = #tpu.pipeline_mode<synchronous>, transform_indices = @transform_2, window_bounds = array<i64: 768, 256>}, {pipeline_mode = #tpu.pipeline_mode<synchronous>, transform_indices = @transform_3, window_bounds = array<i64: 768, 256>}, {pipeline_mode = #tpu.pipeline_mode<synchronous>, transform_indices = @transform_4, window_bounds = array<i64: 1, 256>}, {pipeline_mode = #tpu.pipeline_mode<synchronous>, transform_indices = @transform_5, window_bounds = array<i64: 256, 64>}, {pipeline_mode = #tpu.pipeline_mode<synchronous>, transform_indices = @transform_6, window_bounds = array<i64: 1, 64>}, {pipeline_mode = #tpu.pipeline_mode<synchronous>, transform_indices = @transform_7, window_bounds = array<i64: 1, 64>}, {transform_indices = @transform_8, window_bounds = array<i64: 1, 1>}, {transform_indices = @transform_9, window_bounds = array<i64: 1, 16>}]} {
    %c0 = arith.constant 0 : index
    %c0_0 = arith.constant 0 : index
    %0 = vector.load %arg1[%c0, %c0_0] : memref<16x768xbf16, #tpu.memory_space<vmem>>, vector<16x768xbf16>
    %c0_1 = arith.constant 0 : index
    %c0_2 = arith.constant 0 : index
    %1 = vector.load %arg3[%c0_1, %c0_2] : memref<768x256xbf16, #tpu.memory_space<vmem>>, vector<768x256xbf16>
    %cst = arith.constant dense<0.000000e+00> : vector<16x256xf32>
    %2 = tpu.matmul %0, %1, %cst {dimension_numbers = #tpu.dot_dimension_numbers<[1], [0], [0], [1], [0, 0, 1, 1], [], []>} : vector<16x768xbf16>, vector<768x256xbf16>, vector<16x256xf32> -> vector<16x256xf32>
    %c0_3 = arith.constant 0 : index
    %c0_4 = arith.constant 0 : index
    %3 = vector.load %arg2[%c0_3, %c0_4] : memref<16x768xbf16, #tpu.memory_space<vmem>>, vector<16x768xbf16>
    %c0_5 = arith.constant 0 : index
    %c0_6 = arith.constant 0 : index
    %4 = vector.load %arg4[%c0_5, %c0_6] : memref<768x256xbf16, #tpu.memory_space<vmem>>, vector<768x256xbf16>
    %cst_7 = arith.constant dense<0.000000e+00> : vector<16x256xf32>
    %5 = tpu.matmul %3, %4, %cst_7 {dimension_numbers = #tpu.dot_dimension_numbers<[1], [0], [0], [1], [0, 0, 1, 1], [], []>} : vector<16x768xbf16>, vector<768x256xbf16>, vector<16x256xf32> -> vector<16x256xf32>
    %6 = arith.addf %2, %5 : vector<16x256xf32>
    %c0_8 = arith.constant 0 : index
    %c0_9 = arith.constant 0 : index
    %7 = vector.load %arg5[%c0_8, %c0_9] : memref<1x256xf32, #tpu.memory_space<vmem>>, vector<1x256xf32>
    %8 = vector.broadcast %7 : vector<1x256xf32> to vector<16x256xf32>
    %9 = arith.addf %6, %8 : vector<16x256xf32>
    %cst_10 = arith.constant 0.000000e+00 : f32
    %10 = vector.broadcast %cst_10 : f32 to vector<16x256xf32>
    %11 = arith.maximumf %9, %10 : vector<16x256xf32>
    %12 = arith.truncf %11 : vector<16x256xf32> to vector<16x256xbf16>
    %c0_11 = arith.constant 0 : index
    %c0_12 = arith.constant 0 : index
    %13 = vector.load %arg6[%c0_11, %c0_12] : memref<256x64xbf16, #tpu.memory_space<vmem>>, vector<256x64xbf16>
    %cst_13 = arith.constant dense<0.000000e+00> : vector<16x64xf32>
    %14 = tpu.matmul %12, %13, %cst_13 {dimension_numbers = #tpu.dot_dimension_numbers<[1], [0], [0], [1], [0, 0, 1, 1], [], []>} : vector<16x256xbf16>, vector<256x64xbf16>, vector<16x64xf32> -> vector<16x64xf32>
    %c0_14 = arith.constant 0 : index
    %c0_15 = arith.constant 0 : index
    %15 = vector.load %arg7[%c0_14, %c0_15] : memref<1x64xf32, #tpu.memory_space<vmem>>, vector<1x64xf32>
    %16 = vector.broadcast %15 : vector<1x64xf32> to vector<16x64xf32>
    %17 = arith.addf %14, %16 : vector<16x64xf32>
    %cst_16 = arith.constant 0.000000e+00 : f32
    %18 = vector.broadcast %cst_16 : f32 to vector<16x64xf32>
    %19 = arith.maximumf %17, %18 : vector<16x64xf32>
    %c0_17 = arith.constant 0 : index
    %c0_18 = arith.constant 0 : index
    %20 = vector.load %arg8[%c0_17, %c0_18] : memref<1x64xf32, #tpu.memory_space<vmem>>, vector<1x64xf32>
    %21 = vector.broadcast %20 : vector<1x64xf32> to vector<16x64xf32>
    %22 = arith.mulf %19, %21 : vector<16x64xf32>
    %cst_19 = arith.constant dense<0.000000e+00> : vector<16xf32>
    %23 = vector.multi_reduction <add>, %22, %cst_19 [1] : vector<16x64xf32> to vector<16xf32>
    %c0_20 = arith.constant 0 : index
    %c0_21 = arith.constant 0 : index
    %24 = memref.load %arg9[%c0_20, %c0_21] : memref<1x1xf32, #tpu.memory_space<smem>>
    %25 = vector.broadcast %24 : f32 to vector<16xf32>
    %26 = arith.addf %23, %25 : vector<16xf32>
    %27 = vector.shape_cast %26 : vector<16xf32> to vector<1x16xf32>
    %c0_22 = arith.constant 0 : index
    %c0_23 = arith.constant 0 : index
    %28 = vector.load %arg10[%c0_22, %c0_23] : memref<1x16xf32, #tpu.memory_space<vmem>>, vector<1x16xf32>
    tpu.vector_store %arg10[%c0_22, %c0_23], %27 {strides = array<i32>} : memref<1x16xf32, #tpu.memory_space<vmem>>, vector<1x16xf32>,
    return
  }
  func.func @transform_0(%arg0: i32) -> (i32, i32) {
    %c0_i32 = arith.constant 0 : i32
    %c0_i32_0 = arith.constant 0 : i32
    return %arg0, %c0_i32 : i32, i32
  }
  func.func @transform_1(%arg0: i32) -> (i32, i32) {
    %c0_i32 = arith.constant 0 : i32
    %c0_i32_0 = arith.constant 0 : i32
    return %arg0, %c0_i32 : i32, i32
  }
  func.func @transform_2(%arg0: i32) -> (i32, i32) {
    %c0_i32 = arith.constant 0 : i32
    %c0_i32_0 = arith.constant 0 : i32
    %c0_i32_1 = arith.constant 0 : i32
    return %c0_i32, %c0_i32_0 : i32, i32
  }
  func.func @transform_3(%arg0: i32) -> (i32, i32) {
    %c0_i32 = arith.constant 0 : i32
    %c0_i32_0 = arith.constant 0 : i32
    %c0_i32_1 = arith.constant 0 : i32
    return %c0_i32, %c0_i32_0 : i32, i32
  }
  func.func @transform_4(%arg0: i32) -> (i32, i32) {
    %c0_i32 = arith.constant 0 : i32
    %c0_i32_0 = arith.constant 0 : i32
    %c0_i32_1 = arith.constant 0 : i32
    return %c0_i32, %c0_i32_0 : i32, i32
  }
  func.func @transform_5(%arg0: i32) -> (i32, i32) {
    %c0_i32 = arith.constant 0 : i32
    %c0_i32_0 = arith.constant 0 : i32
    %c0_i32_1 = arith.constant 0 : i32
    return %c0_i32, %c0_i32_0 : i32, i32
  }
  func.func @transform_6(%arg0: i32) -> (i32, i32) {
    %c0_i32 = arith.constant 0 : i32
    %c0_i32_0 = arith.constant 0 : i32
    %c0_i32_1 = arith.constant 0 : i32
    return %c0_i32, %c0_i32_0 : i32, i32
  }
  func.func @transform_7(%arg0: i32) -> (i32, i32) {
    %c0_i32 = arith.constant 0 : i32
    %c0_i32_0 = arith.constant 0 : i32
    %c0_i32_1 = arith.constant 0 : i32
    return %c0_i32, %c0_i32_0 : i32, i32
  }
  func.func @transform_8(%arg0: i32) -> (i32, i32) {
    %c0_i32 = arith.constant 0 : i32
    %c0_i32_0 = arith.constant 0 : i32
    %c0_i32_1 = arith.constant 0 : i32
    return %c0_i32, %c0_i32_0 : i32, i32
  }
  func.func @transform_9(%arg0: i32) -> (i32, i32) {
    %c0_i32 = arith.constant 0 : i32
    %c0_i32_0 = arith.constant 0 : i32
    return %c0_i32, %arg0 : i32, i32
  }
}

</mosaic_0001>

<bundles_post_ra>
// kernel: tpu_custom_call.1
= control target key start
LH: loop header
LB: loop body
LE: loop exit
PB: predicated region body
PF: predicated region fallthrough
CT: control target
= control target key end

     0   :  { %15 = vsyncpa [#allocation4], 0  ;;  %s2655_s0 = inlined_call_operand.vmem [shape: bf16[16,768], index: 0, kind: input, shape index: {}]   ;;  %s2656_s1 = inlined_call_operand.vmem [shape: bf16[16,768], index: 1, kind: input, shape index: {}]   ;;  %s2657_s2 = inlined_call_operand.hbm [shape: bf16[768,256], index: 2, kind: input, shape index: {}]   ;;  %s2658_s3 = inlined_call_operand.hbm [shape: bf16[768,256], index: 3, kind: input, shape index: {}]   ;;  %s2659_s4 = inlined_call_operand.vmem [shape: f32[1,256], index: 4, kind: input, shape index: {}]   ;;  %s2660_s5 = inlined_call_operand.vmem [shape: bf16[256,64], index: 5, kind: input, shape index: {}]   ;;  %s2661_s6 = inlined_call_operand.vmem [shape: f32[1,64], index: 6, kind: input, shape index: {}]   ;;  %s2662_s7 = inlined_call_operand.vmem [shape: f32[1,64], index: 7, kind: input, shape index: {}]   ;;  %s2663_s8 = inlined_call_operand.<no memory space> [shape: f32[1,1], index: 8, kind: input, shape index: {}]   ;;  %s2664_s9 = inlined_call_operand.hbm [shape: f32[1,16], index: 9, kind: output, shape index: {}]  }
   0x1   :  { %16 = vsyncpa [#allocation7], 0 }
   0x2   :  { %17 = vsyncpa [#allocation5], 0  ;;  %s2462_s30 = smov [#allocation3]   ;;  %s2390_s13 = scalar_lea.hbm %s2657_s2, 12288 }
   0x3   :  { %s27_s10 = sshll.u32 %s2462_s30, 4  ;;  %p2391_p0 = scmp.ne.s32.totalorder %s2657_s2, %s2390_s13  ;;  %s28_s10 = int_to_ptr.vmem [resolvable:$true] %s27_s10 }
   0x4   :  { %p2394_p1 = scmp.lt.u32.totalorder %s2390_s13, %s2657_s2 }
   0x6   :  { %p2396_p2 = pnand %p2394_p1, %p2391_p0 }
   0x8   :  { %2399 = shalt.err (!%p2396_p2)
}
   0x9   :  { %s2400_s18 = scalar_lea.vmem %s28_s10, 12288  ;;  %p2405_p4 = scmp.lt.s32.totalorder %s28_s10, %s28_s10 }
   0xa   :  { %p2401_p3 = scmp.ne.s32.totalorder %s28_s10, %s2400_s18  ;;  %p2406_p5 = scmp.lt.s32.totalorder %s2400_s18, %s2400_s18 }
   0xc   :  { %p2407_p6 = por %p2406_p5, %p2405_p4 }
   0xe   :  { %p2408_p7 = pnand %p2407_p6, %p2401_p3 }
  0x10   :  { %2411 = shalt.err (!%p2408_p7)
}
  0x11   :  { %s2463_s19 = smov 128   ;;  %s2464_s20 = smov 8  }
  0x12   :  { %33 = dma.hbm_to_vmem [thread:$0]  %s2657_s2, 12288, %s28_s10, [#allocation4], %s2463_s19, %s2463_s19, %s2464_s20  }
  0x13   :  { %s2465_s23 = smov [#allocation6]   ;;  %s2412_s27 = scalar_lea.hbm %s2658_s3, 12288 }
  0x14   :  { %s39_s24 = sshll.u32 %s2465_s23, 4  ;;  %p2413_p8 = scmp.ne.s32.totalorder %s2658_s3, %s2412_s27  ;;  %s40_s24 = int_to_ptr.vmem [resolvable:$true] %s39_s24 }
  0x15   :  { %p2416_p9 = scmp.lt.u32.totalorder %s2412_s27, %s2658_s3 }
  0x17   :  { %p2418_p10 = pnand %p2416_p9, %p2413_p8 }
  0x19   :  { %2421 = shalt.err (!%p2418_p10)
}
  0x1a   :  { %s2422_s12 = scalar_lea.vmem %s40_s24, 12288  ;;  %p2427_p12 = scmp.lt.s32.totalorder %s40_s24, %s40_s24 }
  0x1b   :  { %p2423_p11 = scmp.ne.s32.totalorder %s40_s24, %s2422_s12  ;;  %p2428_p13 = scmp.lt.s32.totalorder %s2422_s12, %s2422_s12 }
  0x1d   :  { %p2429_p0 = por %p2428_p13, %p2427_p12 }
  0x1f   :  { %p2430_p1 = pnand %p2429_p0, %p2423_p11 }
  0x21   :  { %2433 = shalt.err (!%p2430_p1)
}
  0x22   :  { %45 = dma.hbm_to_vmem [thread:$0]  %s2658_s3, 12288, %s40_s24, [#allocation7], %s2463_s19, %s2463_s19, %s2464_s20  }
  0x23   :  { %2456 = dma.done.wait [#allocation4], 12288  }
  0x24   :  { %2457 = vsyncadd [#allocation4], 4294955008 }
  0x25   :  { %2458 = dma.done.wait [#allocation7], 12288  }
  0x26   :  { %2459 = vsyncadd [#allocation7], 4294955008  ;;  %v2068_v0 = vld [vmem:[#allocation6 + $0x4] ss:$8 sps:$4 sm:$0xff]   ;;  %v2072_v2 = vld [vmem:[#allocation6] ss:$8 sps:$4 sm:$0xff]  }
  0x27   :  { %v2070_v1 = vld [vmem:[#allocation3 + $0x4] ss:$8 sps:$4 sm:$0xff]   ;;  %777 = vmatprep.subr.bf16.mxu1 %v2068_v0  ;;  %v2073_v3 = vld [vmem:[#allocation3] ss:$8 sps:$4 sm:$0xff]   ;;  %v2074_v4 = vld [vmem:[#allocation6 + $0x14] ss:$8 sps:$4 sm:$0xff]  }
  0x28   :  { %1416 = vmatprep.subr.bf16.mxu0 %v2070_v1  ;;  %778 = vmatpush1.bf16.msra.mxu1 %v2072_v2  ;;  %v2076_v5 = vld [vmem:[#allocation3 + $0x14] ss:$8 sps:$4 sm:$0xff]   ;;  %v2078_v6 = vld [vmem:[#allocation6 + $0x10] ss:$8 sps:$4 sm:$0xff]   ;;  %v2080_v8 = vld [vmem:[#allocation6 + $0x24] ss:$8 sps:$4 sm:$0xff]  }
  0x29   :  { %1417 = vmatpush1.bf16.msra.mxu0 %v2073_v3  ;;  %779 = vmatprep.subr.bf16.mxu1 %v2074_v4  ;;  %v2079_v7 = vld [vmem:[#allocation3 + $0x10] ss:$8 sps:$4 sm:$0xff]   ;;  %v2082_v9 = vld [vmem:[#allocation3 + $0x24] ss:$8 sps:$4 sm:$0xff]   ;;  %v2084_v10 = vld [vmem:[#allocation6 + $0x20] ss:$8 sps:$4 sm:$0xff]  }
  0x2a   :  { %1418 = vmatprep.subr.bf16.mxu0 %v2076_v5  ;;  %v2085_v11 = vld [vmem:[#allocation3 + $0x20] ss:$8 sps:$4 sm:$0xff]   ;;  %v2086_v12 = vld [vmem:[#allocation6 + $0x34] ss:$8 sps:$4 sm:$0xff]   ;;  %v2090_v14 = vld [vmem:[#allocation6 + $0x30] ss:$8 sps:$4 sm:$0xff]  }
  0x2b   :  { %v2088_v13 = vld [vmem:[#allocation3 + $0x34] ss:$8 sps:$4 sm:$0xff]   ;;  %v2091_v15 = vld [vmem:[#allocation3 + $0x30] ss:$8 sps:$4 sm:$0xff]   ;;  %v2092_v16 = vld [vmem:[#allocation6 + $0x44] ss:$8 sps:$4 sm:$0xff]  }
  0x2c   :  { %780 = vmatpush1.bf16.msra.mxu1 %v2078_v6  ;;  %v2094_v17 = vld [vmem:[#allocation3 + $0x44] ss:$8 sps:$4 sm:$0xff]   ;;  %v2096_v18 = vld [vmem:[#allocation6 + $0x40] ss:$8 sps:$4 sm:$0xff]   ;;  %v2098_v20 = vld [vmem:[#allocation6 + $0x54] ss:$8 sps:$4 sm:$0xff]  }
  0x2d   :  { %1419 = vmatpush1.bf16.msra.mxu0 %v2079_v7  ;;  %781 = vmatprep.subr.bf16.mxu1 %v2080_v8  ;;  %v2097_v19 = vld [vmem:[#allocation3 + $0x40] ss:$8 sps:$4 sm:$0xff]   ;;  %v2100_v21 = vld [vmem:[#allocation3 + $0x54] ss:$8 sps:$4 sm:$0xff]   ;;  %v2102_v22 = vld [vmem:[#allocation6 + $0x50] ss:$8 sps:$4 sm:$0xff]  }
  0x2e   :  { %1420 = vmatprep.subr.bf16.mxu0 %v2082_v9  ;;  %v2103_v23 = vld [vmem:[#allocation3 + $0x50] ss:$8 sps:$4 sm:$0xff]   ;;  %v2104_v24 = vld [vmem:[#allocation6 + $0x64] ss:$8 sps:$4 sm:$0xff]   ;;  %v2108_v26 = vld [vmem:[#allocation6 + $0x60] ss:$8 sps:$4 sm:$0xff]  }
  0x2f   :  { %v2106_v25 = vld [vmem:[#allocation3 + $0x64] ss:$8 sps:$4 sm:$0xff]   ;;  %v2109_v27 = vld [vmem:[#allocation3 + $0x60] ss:$8 sps:$4 sm:$0xff]   ;;  %v2110_v28 = vld [vmem:[#allocation6 + $0x74] ss:$8 sps:$4 sm:$0xff]  }
  0x30   :  { %782 = vmatpush1.bf16.msra.mxu1 %v2084_v10  ;;  %v2112_v29 = vld [vmem:[#allocation3 + $0x74] ss:$8 sps:$4 sm:$0xff]   ;;  %v2114_v30 = vld [vmem:[#allocation6 + $0x70] ss:$8 sps:$4 sm:$0xff]   ;;  %v2116_v32 = vld [vmem:[#allocation6 + $0x84] ss:$8 sps:$4 sm:$0xff]  }
  0x31   :  { %1421 = vmatpush1.bf16.msra.mxu0 %v2085_v11  ;;  %783 = vmatprep.subr.bf16.mxu1 %v2086_v12  ;;  %v2115_v31 = vld [vmem:[#allocation3 + $0x70] ss:$8 sps:$4 sm:$0xff]   ;;  %v2118_v33 = vld [vmem:[#allocation3 + $0x84] ss:$8 sps:$4 sm:$0xff]   ;;  %v2120_v34 = vld [vmem:[#allocation6 + $0x80] ss:$8 sps:$4 sm:$0xff]  }
  0x32   :  { %1422 = vmatprep.subr.bf16.mxu0 %v2088_v13  ;;  %v2121_v35 = vld [vmem:[#allocation3 + $0x80] ss:$8 sps:$4 sm:$0xff]   ;;  %v2122_v36 = vld [vmem:[#allocation6 + $0x94] ss:$8 sps:$4 sm:$0xff]   ;;  %v2126_v38 = vld [vmem:[#allocation6 + $0x90] ss:$8 sps:$4 sm:$0xff]  }
  0x33   :  { %v2124_v37 = vld [vmem:[#allocation3 + $0x94] ss:$8 sps:$4 sm:$0xff]   ;;  %v2127_v39 = vld [vmem:[#allocation3 + $0x90] ss:$8 sps:$4 sm:$0xff]   ;;  %v2128_v40 = vld [vmem:[#allocation6 + $0xa4] ss:$8 sps:$4 sm:$0xff]  }
  0x34   :  { %784 = vmatpush1.bf16.msra.mxu1 %v2090_v14  ;;  %v2130_v41 = vld [vmem:[#allocation3 + $0xa4] ss:$8 sps:$4 sm:$0xff]   ;;  %v2132_v42 = vld [vmem:[#allocation6 + $0xa0] ss:$8 sps:$4 sm:$0xff]   ;;  %v2134_v44 = vld [vmem:[#allocation6 + $0xb4] ss:$8 sps:$4 sm:$0xff]  }
  0x35   :  { %1423 = vmatpush1.bf16.msra.mxu0 %v2091_v15  ;;  %785 = vmatprep.subr.bf16.mxu1 %v2092_v16  ;;  %v2133_v43 = vld [vmem:[#allocation3 + $0xa0] ss:$8 sps:$4 sm:$0xff]   ;;  %v2136_v45 = vld [vmem:[#allocation3 + $0xb4] ss:$8 sps:$4 sm:$0xff]   ;;  %v2138_v46 = vld [vmem:[#allocation6 + $0xb0] ss:$8 sps:$4 sm:$0xff]  }
  0x36   :  { %1424 = vmatprep.subr.bf16.mxu0 %v2094_v17  ;;  %v2139_v47 = vld [vmem:[#allocation3 + $0xb0] ss:$8 sps:$4 sm:$0xff]   ;;  %v2166_v48 = vld [vmem:[%s2656_s1 + $0x4] ss:$24 sps:$4 sm:$0xff]   ;;  %v2144_v52 = vld [vmem:[#allocation6 + $0xc0] ss:$8 sps:$4 sm:$0xff]  }
  0x37   :  { %v2140_v49 = vld [vmem:[#allocation6 + $0xc4] ss:$8 sps:$4 sm:$0xff]   ;;  %809 = vmatprep.mubr.bf16.mxu1 %v2166_v48  ;;  %v2145_v53 = vld [vmem:[#allocation3 + $0xc0] ss:$8 sps:$4 sm:$0xff]   ;;  %v2146_v54 = vld [vmem:[#allocation6 + $0xd4] ss:$8 sps:$4 sm:$0xff]  }
  0x38   :  { %786 = vmatpush1.bf16.msra.mxu1 %v2096_v18  ;;  %v2142_v50 = vld [vmem:[#allocation3 + $0xc4] ss:$8 sps:$4 sm:$0xff]   ;;  %v2148_v55 = vld [vmem:[#allocation3 + $0xd4] ss:$8 sps:$4 sm:$0xff]   ;;  %v2150_v56 = vld [vmem:[#allocation6 + $0xd0] ss:$8 sps:$4 sm:$0xff]  }
  0x39   :  { %1425 = vmatpush1.bf16.msra.mxu0 %v2097_v19  ;;  %787 = vmatprep.subr.bf16.mxu1 %v2098_v20  ;;  %v2172_v51 = vld [vmem:[%s2655_s0 + $0x4] ss:$24 sps:$4 sm:$0xff]   ;;  %v2151_v57 = vld [vmem:[#allocation3 + $0xd0] ss:$8 sps:$4 sm:$0xff]   ;;  %v2156_v60 = vld [vmem:[#allocation6 + $0xe0] ss:$8 sps:$4 sm:$0xff]  }
  0x3a   :  { %1426 = vmatprep.subr.bf16.mxu0 %v2100_v21  ;;  %1448 = vmatprep.mubr.bf16.mxu0 %v2172_v51  ;;  %v2152_v58 = vld [vmem:[#allocation6 + $0xe4] ss:$8 sps:$4 sm:$0xff]   ;;  %v2157_v61 = vld [vmem:[#allocation3 + $0xe0] ss:$8 sps:$4 sm:$0xff]   ;;  %v2158_v62 = vld [vmem:[#allocation6 + $0xf4] ss:$8 sps:$4 sm:$0xff]  }
  0x3b   :  { %v2154_v59 = vld [vmem:[#allocation3 + $0xe4] ss:$8 sps:$4 sm:$0xff]   ;;  %v2160_v63 = vld [vmem:[#allocation3 + $0xf4] ss:$8 sps:$4 sm:$0xff]   ;;  %v2162_v0 = vld [vmem:[#allocation6 + $0xf0] ss:$8 sps:$4 sm:$0xff]  }
  0x3c   :  { %788 = vmatpush1.bf16.msra.mxu1 %v2102_v22  ;;  %v2163_v1 = vld [vmem:[#allocation3 + $0xf0] ss:$8 sps:$4 sm:$0xff]   ;;  %v2169_v2 = vld [vmem:[#allocation6 + $0x104] ss:$8 sps:$4 sm:$0xff]   ;;  %v2167_v5 = vld [vmem:[#allocation6 + $0x100] ss:$8 sps:$4 sm:$0xff]  }
  0x3d   :  { %1427 = vmatpush1.bf16.msra.mxu0 %v2103_v23  ;;  %789 = vmatprep.subr.bf16.mxu1 %v2104_v24  ;;  %v2175_v3 = vld [vmem:[#allocation3 + $0x104] ss:$8 sps:$4 sm:$0xff]   ;;  %v2164_v4 = vld [vmem:[%s2656_s1] ss:$24 sps:$4 sm:$0xff]   ;;  %v2178_v8 = vld [vmem:[#allocation6 + $0x114] ss:$8 sps:$4 sm:$0xff]  }
  0x3e   :  { %1428 = vmatprep.subr.bf16.mxu0 %v2106_v25  ;;  %v2170_v6 = vld [vmem:[%s2655_s0] ss:$24 sps:$4 sm:$0xff]   ;;  %v2181_v9 = vld [vmem:[#allocation3 + $0x114] ss:$8 sps:$4 sm:$0xff]   ;;  %v2184_v12 = vld [vmem:[#allocation6 + $0x124] ss:$8 sps:$4 sm:$0xff]  }
  0x3f   :  { %v2173_v7 = vld [vmem:[#allocation3 + $0x100] ss:$8 sps:$4 sm:$0xff]   ;;  %v2176_v10 = vld [vmem:[#allocation6 + $0x110] ss:$8 sps:$4 sm:$0xff]   ;;  %v2187_v13 = vld [vmem:[#allocation3 + $0x124] ss:$8 sps:$4 sm:$0xff]  }
  0x40   :  { %790 = vmatpush1.bf16.msra.mxu1 %v2108_v26  ;;  %v2179_v11 = vld [vmem:[#allocation3 + $0x110] ss:$8 sps:$4 sm:$0xff]   ;;  %v2182_v14 = vld [vmem:[#allocation6 + $0x120] ss:$8 sps:$4 sm:$0xff]   ;;  %v2190_v16 = vld [vmem:[#allocation6 + $0x134] ss:$8 sps:$4 sm:$0xff]  }
  0x41   :  { %1429 = vmatpush1.bf16.msra.mxu0 %v2109_v27  ;;  %791 = vmatprep.subr.bf16.mxu1 %v2110_v28  ;;  %v2185_v15 = vld [vmem:[#allocation3 + $0x120] ss:$8 sps:$4 sm:$0xff]   ;;  %v2193_v17 = vld [vmem:[#allocation3 + $0x134] ss:$8 sps:$4 sm:$0xff]   ;;  %v2188_v18 = vld [vmem:[#allocation6 + $0x130] ss:$8 sps:$4 sm:$0xff]  }
  0x42   :  { %1430 = vmatprep.subr.bf16.mxu0 %v2112_v29  ;;  %v2191_v19 = vld [vmem:[#allocation3 + $0x130] ss:$8 sps:$4 sm:$0xff]   ;;  %v2196_v20 = vld [vmem:[#allocation6 + $0x144] ss:$8 sps:$4 sm:$0xff]   ;;  %v2194_v22 = vld [vmem:[#allocation6 + $0x140] ss:$8 sps:$4 sm:$0xff]  }
  0x43   :  { %v2199_v21 = vld [vmem:[#allocation3 + $0x144] ss:$8 sps:$4 sm:$0xff]   ;;  %v2197_v23 = vld [vmem:[#allocation3 + $0x140] ss:$8 sps:$4 sm:$0xff]   ;;  %v2202_v24 = vld [vmem:[#allocation6 + $0x154] ss:$8 sps:$4 sm:$0xff]  }
  0x44   :  { %792 = vmatpush1.bf16.msra.mxu1 %v2114_v30  ;;  %v2205_v25 = vld [vmem:[#allocation3 + $0x154] ss:$8 sps:$4 sm:$0xff]   ;;  %v2200_v26 = vld [vmem:[#allocation6 + $0x150] ss:$8 sps:$4 sm:$0xff]   ;;  %v2208_v28 = vld [vmem:[#allocation6 + $0x164] ss:$8 sps:$4 sm:$0xff]  }
  0x45   :  { %1431 = vmatpush1.bf16.msra.mxu0 %v2115_v31  ;;  %793 = vmatprep.subr.bf16.mxu1 %v2116_v32  ;;  %v2203_v27 = vld [vmem:[#allocation3 + $0x150] ss:$8 sps:$4 sm:$0xff]   ;;  %v2211_v29 = vld [vmem:[#allocation3 + $0x164] ss:$8 sps:$4 sm:$0xff]   ;;  %v2206_v30 = vld [vmem:[#allocation6 + $0x160] ss:$8 sps:$4 sm:$0xff]  }
  0x46   :  { %1432 = vmatprep.subr.bf16.mxu0 %v2118_v33  ;;  %v2209_v31 = vld [vmem:[#allocation3 + $0x160] ss:$8 sps:$4 sm:$0xff]   ;;  %v2214_v32 = vld [vmem:[#allocation6 + $0x174] ss:$8 sps:$4 sm:$0xff]   ;;  %vm1754_vm0 = vcmask 523264   ;;  %vm1778_vm1 = vcmask 130112  }
  0x47   :  { %v2217_v33 = vld [vmem:[#allocation3 + $0x174] ss:$8 sps:$4 sm:$0xff]   ;;  %v2230_v48 = vld [vmem:[#allocation6 + $0x1a0] ss:$8 sps:$4 sm:$0xff]   ;;  %vm1781_vm2 = vcmask 122880  }
  0x48   :  { %794 = vmatpush1.bf16.msra.mxu1 %v2120_v34  ;;  %v2268_v34 = vld [vmem:[%s2656_s1 + $0xc] ss:$24 sps:$4 sm:$0xff]   ;;  %v2241_v51 = vld [vmem:[#allocation3 + $0x1b4] ss:$8 sps:$4 sm:$0xff]  }
  0x49   :  { %1433 = vmatpush1.bf16.msra.mxu0 %v2121_v35  ;;  %795 = vmatprep.subr.bf16.mxu1 %v2122_v36  ;;  %v2212_v35 = vld [vmem:[#allocation6 + $0x170] ss:$8 sps:$4 sm:$0xff]  }
  0x4a   :  { %1434 = vmatprep.subr.bf16.mxu0 %v2124_v37  ;;  %v2215_v36 = vld [vmem:[#allocation3 + $0x170] ss:$8 sps:$4 sm:$0xff]   ;;  %v2274_v37 = vld [vmem:[%s2655_s0 + $0xc] ss:$24 sps:$4 sm:$0xff]  }
  0x4c   :  { %796 = vmatpush1.bf16.msra.mxu1 %v2126_v38  ;;  %v2220_v38 = vld [vmem:[#allocation6 + $0x184] ss:$8 sps:$4 sm:$0xff]  }
  0x4d   :  { %1435 = vmatpush1.bf16.msra.mxu0 %v2127_v39  ;;  %797 = vmatprep.subr.bf16.mxu1 %v2128_v40  ;;  %v2223_v39 = vld [vmem:[#allocation3 + $0x184] ss:$8 sps:$4 sm:$0xff]   ;;  %v2218_v40 = vld [vmem:[#allocation6 + $0x180] ss:$8 sps:$4 sm:$0xff]  }
  0x4e   :  { %1436 = vmatprep.subr.bf16.mxu0 %v2130_v41  ;;  %v2221_v41 = vld [vmem:[#allocation3 + $0x180] ss:$8 sps:$4 sm:$0xff]  }
  0x50   :  { %798 = vmatpush1.bf16.msra.mxu1 %v2132_v42  ;;  %v2226_v42 = vld [vmem:[#allocation6 + $0x194] ss:$8 sps:$4 sm:$0xff]  }
  0x51   :  { %1437 = vmatpush1.bf16.msra.mxu0 %v2133_v43  ;;  %799 = vmatprep.subr.bf16.mxu1 %v2134_v44  ;;  %v2229_v43 = vld [vmem:[#allocation3 + $0x194] ss:$8 sps:$4 sm:$0xff]   ;;  %v2224_v44 = vld [vmem:[#allocation6 + $0x190] ss:$8 sps:$4 sm:$0xff]  }
  0x52   :  { %1438 = vmatprep.subr.bf16.mxu0 %v2136_v45  ;;  %v2227_v45 = vld [vmem:[#allocation3 + $0x190] ss:$8 sps:$4 sm:$0xff]  }
  0x54   :  { %800 = vmatpush1.bf16.msra.mxu1 %v2138_v46  ;;  %v2232_v46 = vld [vmem:[#allocation6 + $0x1a4] ss:$8 sps:$4 sm:$0xff]  }
  0x55   :  { %1439 = vmatpush1.bf16.msra.mxu0 %v2139_v47  ;;  %801 = vmatprep.subr.bf16.mxu1 %v2140_v49  ;;  %v2235_v47 = vld [vmem:[#allocation3 + $0x1a4] ss:$8 sps:$4 sm:$0xff]   ;;  %v2233_v49 = vld [vmem:[#allocation3 + $0x1a0] ss:$8 sps:$4 sm:$0xff]  }
  0x56   :  { %1440 = vmatprep.subr.bf16.mxu0 %v2142_v50  ;;  %v2238_v50 = vld [vmem:[#allocation6 + $0x1b4] ss:$8 sps:$4 sm:$0xff]  }
  0x58   :  { %802 = vmatpush1.bf16.msra.mxu1 %v2144_v52  ;;  %v2236_v52 = vld [vmem:[#allocation6 + $0x1b0] ss:$8 sps:$4 sm:$0xff]  }
  0x59   :  { %1441 = vmatpush1.bf16.msra.mxu0 %v2145_v53  ;;  %803 = vmatprep.subr.bf16.mxu1 %v2146_v54  ;;  %v2239_v53 = vld [vmem:[#allocation3 + $0x1b0] ss:$8 sps:$4 sm:$0xff]   ;;  %v2244_v54 = vld [vmem:[#allocation6 + $0x1c4] ss:$8 sps:$4 sm:$0xff]  }
  0x5a   :  { %1442 = vmatprep.subr.bf16.mxu0 %v2148_v55  ;;  %v2247_v55 = vld [vmem:[#allocation3 + $0x1c4] ss:$8 sps:$4 sm:$0xff]  }
  0x5c   :  { %804 = vmatpush1.bf16.msra.mxu1 %v2150_v56  ;;  %v2242_v56 = vld [vmem:[#allocation6 + $0x1c0] ss:$8 sps:$4 sm:$0xff]  }
  0x5d   :  { %1443 = vmatpush1.bf16.msra.mxu0 %v2151_v57  ;;  %805 = vmatprep.subr.bf16.mxu1 %v2152_v58  ;;  %v2245_v57 = vld [vmem:[#allocation3 + $0x1c0] ss:$8 sps:$4 sm:$0xff]   ;;  %v2250_v58 = vld [vmem:[#allocation6 + $0x1d4] ss:$8 sps:$4 sm:$0xff]  }
  0x5e   :  { %1444 = vmatprep.subr.bf16.mxu0 %v2154_v59  ;;  %v2253_v59 = vld [vmem:[#allocation3 + $0x1d4] ss:$8 sps:$4 sm:$0xff]  }
  0x60   :  { %806 = vmatpush1.bf16.msra.mxu1 %v2156_v60  ;;  %v2248_v60 = vld [vmem:[#allocation6 + $0x1d0] ss:$8 sps:$4 sm:$0xff]  }
  0x61   :  { %1445 = vmatpush1.bf16.msra.mxu0 %v2157_v61  ;;  %807 = vmatprep.subr.bf16.mxu1 %v2158_v62  ;;  %v2251_v61 = vld [vmem:[#allocation3 + $0x1d0] ss:$8 sps:$4 sm:$0xff]   ;;  %v2256_v62 = vld [vmem:[#allocation6 + $0x1e4] ss:$8 sps:$4 sm:$0xff]  }
  0x62   :  { %1446 = vmatprep.subr.bf16.mxu0 %v2160_v63  ;;  %v2259_v63 = vld [vmem:[#allocation3 + $0x1e4] ss:$8 sps:$4 sm:$0xff]  }
  0x64   :  { %808 = vmatpush1.bf16.msra.mxu1 %v2162_v0  ;;  %v2254_v0 = vld [vmem:[#allocation6 + $0x1e0] ss:$8 sps:$4 sm:$0xff]  }
  0x65   :  { %1447 = vmatpush1.bf16.msra.mxu0 %v2163_v1  ;;  %820 = vmatprep.subr.bf16.mxu1 %v2169_v2  ;;  %v2257_v1 = vld [vmem:[#allocation3 + $0x1e0] ss:$8 sps:$4 sm:$0xff]   ;;  %v2262_v2 = vld [vmem:[#allocation6 + $0x1f4] ss:$8 sps:$4 sm:$0xff]  }
  0x66   :  { %1459 = vmatprep.subr.bf16.mxu0 %v2175_v3  ;;  %v2265_v3 = vld [vmem:[#allocation3 + $0x1f4] ss:$8 sps:$4 sm:$0xff]  }
  0x67   :  { %810 = vmatmul.mubr.bf16.vlgmr.msra.gmra.mrb[0].mxu1 %v2164_v4  ;;  %v2260_v4 = vld [vmem:[#allocation6 + $0x1f0] ss:$8 sps:$4 sm:$0xff]  }
  0x68   :  { %1449 = vmatmul.mubr.bf16.vlgmr.msra.gmra.mrb[0].mxu0 %v2170_v6  ;;  %821 = vmatpush1.bf16.msra.mxu1 %v2167_v5  ;;  %v2263_v5 = vld [vmem:[#allocation3 + $0x1f0] ss:$8 sps:$4 sm:$0xff]   ;;  %v2271_v6 = vld [vmem:[#allocation6 + $0x204] ss:$8 sps:$4 sm:$0xff]  }
  0x69   :  { %1460 = vmatpush1.bf16.msra.mxu0 %v2173_v7  ;;  %822 = vmatprep.subr.bf16.mxu1 %v2178_v8  ;;  %v2277_v7 = vld [vmem:[#allocation3 + $0x204] ss:$8 sps:$4 sm:$0xff]   ;;  %v2266_v8 = vld [vmem:[%s2656_s1 + $0x8] ss:$24 sps:$4 sm:$0xff]  }
  0x6a   :  { %1461 = vmatprep.subr.bf16.mxu0 %v2181_v9  ;;  %852 = vmatprep.mubr.bf16.mxu1 %v2268_v34  ;;  %v2269_v9 = vld [vmem:[#allocation6 + $0x200] ss:$8 sps:$4 sm:$0xff]   ;;  %v2310_v34 = vld [vmem:[#allocation6 + $0x264] ss:$8 sps:$4 sm:$0xff]  }
  0x6b   :  { %1491 = vmatprep.mubr.bf16.mxu0 %v2274_v37  ;;  %v2311_v37 = vld [vmem:[#allocation3 + $0x260] ss:$8 sps:$4 sm:$0xff]  }
  0x6c   :  { %823 = vmatpush1.bf16.msra.mxu1 %v2176_v10  ;;  %v2272_v10 = vld [vmem:[%s2655_s0 + $0x8] ss:$24 sps:$4 sm:$0xff]  }
  0x6d   :  { %1462 = vmatpush1.bf16.msra.mxu0 %v2179_v11  ;;  %824 = vmatprep.subr.bf16.mxu1 %v2184_v12  ;;  %v2275_v11 = vld [vmem:[#allocation3 + $0x200] ss:$8 sps:$4 sm:$0xff]   ;;  %v2280_v12 = vld [vmem:[#allocation6 + $0x214] ss:$8 sps:$4 sm:$0xff]  }
  0x6e   :  { %1463 = vmatprep.subr.bf16.mxu0 %v2187_v13  ;;  %v2283_v13 = vld [vmem:[#allocation3 + $0x214] ss:$8 sps:$4 sm:$0xff]  }
  0x70   :  { %825 = vmatpush1.bf16.msra.mxu1 %v2182_v14  ;;  %v2278_v14 = vld [vmem:[#allocation6 + $0x210] ss:$8 sps:$4 sm:$0xff]  }
  0x71   :  { %1464 = vmatpush1.bf16.msra.mxu0 %v2185_v15  ;;  %826 = vmatprep.subr.bf16.mxu1 %v2190_v16  ;;  %v2281_v15 = vld [vmem:[#allocation3 + $0x210] ss:$8 sps:$4 sm:$0xff]   ;;  %v2286_v16 = vld [vmem:[#allocation6 + $0x224] ss:$8 sps:$4 sm:$0xff]  }
  0x72   :  { %1465 = vmatprep.subr.bf16.mxu0 %v2193_v17  ;;  %v2289_v17 = vld [vmem:[#allocation3 + $0x224] ss:$8 sps:$4 sm:$0xff]  }
  0x74   :  { %827 = vmatpush1.bf16.msra.mxu1 %v2188_v18  ;;  %v2284_v18 = vld [vmem:[#allocation6 + $0x220] ss:$8 sps:$4 sm:$0xff]  }
  0x75   :  { %1466 = vmatpush1.bf16.msra.mxu0 %v2191_v19  ;;  %828 = vmatprep.subr.bf16.mxu1 %v2196_v20  ;;  %v2370_v19 = vld [vmem:[%s2656_s1 + $0x14] ss:$24 sps:$4 sm:$0xff]   ;;  %v2287_v20 = vld [vmem:[#allocation3 + $0x220] ss:$8 sps:$4 sm:$0xff]  }
  0x76   :  { %1467 = vmatprep.subr.bf16.mxu0 %v2199_v21  ;;  %v2373_v21 = vld [vmem:[%s2655_s0 + $0x14] ss:$24 sps:$4 sm:$0xff]  }
  0x78   :  { %829 = vmatpush1.bf16.msra.mxu1 %v2194_v22  ;;  %v2292_v22 = vld [vmem:[#allocation6 + $0x234] ss:$8 sps:$4 sm:$0xff]  }
  0x79   :  { %1468 = vmatpush1.bf16.msra.mxu0 %v2197_v23  ;;  %830 = vmatprep.subr.bf16.mxu1 %v2202_v24  ;;  %v2295_v23 = vld [vmem:[#allocation3 + $0x234] ss:$8 sps:$4 sm:$0xff]   ;;  %v2290_v24 = vld [vmem:[#allocation6 + $0x230] ss:$8 sps:$4 sm:$0xff]  }
  0x7a   :  { %1469 = vmatprep.subr.bf16.mxu0 %v2205_v25  ;;  %v2293_v25 = vld [vmem:[#allocation3 + $0x230] ss:$8 sps:$4 sm:$0xff]  }
  0x7c   :  { %831 = vmatpush1.bf16.msra.mxu1 %v2200_v26  ;;  %v2298_v26 = vld [vmem:[#allocation6 + $0x244] ss:$8 sps:$4 sm:$0xff]  }
  0x7d   :  { %1470 = vmatpush1.bf16.msra.mxu0 %v2203_v27  ;;  %832 = vmatprep.subr.bf16.mxu1 %v2208_v28  ;;  %v2301_v27 = vld [vmem:[#allocation3 + $0x244] ss:$8 sps:$4 sm:$0xff]   ;;  %v2296_v28 = vld [vmem:[#allocation6 + $0x240] ss:$8 sps:$4 sm:$0xff]  }
  0x7e   :  { %1471 = vmatprep.subr.bf16.mxu0 %v2211_v29  ;;  %v2299_v29 = vld [vmem:[#allocation3 + $0x240] ss:$8 sps:$4 sm:$0xff]  }
  0x80   :  { %833 = vmatpush1.bf16.msra.mxu1 %v2206_v30  ;;  %v2304_v30 = vld [vmem:[#allocation6 + $0x254] ss:$8 sps:$4 sm:$0xff]  }
  0x81   :  { %1472 = vmatpush1.bf16.msra.mxu0 %v2209_v31  ;;  %834 = vmatprep.subr.bf16.mxu1 %v2214_v32  ;;  %v2307_v31 = vld [vmem:[#allocation3 + $0x254] ss:$8 sps:$4 sm:$0xff]   ;;  %v2302_v32 = vld [vmem:[#allocation6 + $0x250] ss:$8 sps:$4 sm:$0xff]  }
  0x82   :  { %1473 = vmatprep.subr.bf16.mxu0 %v2217_v33  ;;  %v2305_v33 = vld [vmem:[#allocation3 + $0x250] ss:$8 sps:$4 sm:$0xff]  }
  0x84   :  { %835 = vmatpush1.bf16.msra.mxu1 %v2212_v35  ;;  %v2313_v35 = vld [vmem:[#allocation3 + $0x264] ss:$8 sps:$4 sm:$0xff]  }
  0x85   :  { %1474 = vmatpush1.bf16.msra.mxu0 %v2215_v36  ;;  %836 = vmatprep.subr.bf16.mxu1 %v2220_v38  ;;  %v2308_v36 = vld [vmem:[#allocation6 + $0x260] ss:$8 sps:$4 sm:$0xff]   ;;  %v2316_v38 = vld [vmem:[#allocation6 + $0x274] ss:$8 sps:$4 sm:$0xff]  }
  0x86   :  { %1475 = vmatprep.subr.bf16.mxu0 %v2223_v39  ;;  %v2319_v39 = vld [vmem:[#allocation3 + $0x274] ss:$8 sps:$4 sm:$0xff]  }
  0x88   :  { %837 = vmatpush1.bf16.msra.mxu1 %v2218_v40  ;;  %v2314_v40 = vld [vmem:[#allocation6 + $0x270] ss:$8 sps:$4 sm:$0xff]  }
  0x89   :  { %1476 = vmatpush1.bf16.msra.mxu0 %v2221_v41  ;;  %838 = vmatprep.subr.bf16.mxu1 %v2226_v42  ;;  %v2317_v41 = vld [vmem:[#allocation3 + $0x270] ss:$8 sps:$4 sm:$0xff]   ;;  %v2322_v42 = vld [vmem:[#allocation6 + $0x284] ss:$8 sps:$4 sm:$0xff]  }
  0x8a   :  { %1477 = vmatprep.subr.bf16.mxu0 %v2229_v43  ;;  %v2325_v43 = vld [vmem:[#allocation3 + $0x284] ss:$8 sps:$4 sm:$0xff]  }
  0x8c   :  { %839 = vmatpush1.bf16.msra.mxu1 %v2224_v44  ;;  %v2320_v44 = vld [vmem:[#allocation6 + $0x280] ss:$8 sps:$4 sm:$0xff]  }
  0x8d   :  { %1478 = vmatpush1.bf16.msra.mxu0 %v2227_v45  ;;  %840 = vmatprep.subr.bf16.mxu1 %v2232_v46  ;;  %v2323_v45 = vld [vmem:[#allocation3 + $0x280] ss:$8 sps:$4 sm:$0xff]   ;;  %v2328_v46 = vld [vmem:[#allocation6 + $0x294] ss:$8 sps:$4 sm:$0xff]  }
  0x8e   :  { %1479 = vmatprep.subr.bf16.mxu0 %v2235_v47  ;;  %v2331_v47 = vld [vmem:[#allocation3 + $0x294] ss:$8 sps:$4 sm:$0xff]  }
  0x90   :  { %841 = vmatpush1.bf16.msra.mxu1 %v2230_v48  ;;  %v2326_v48 = vld [vmem:[#allocation6 + $0x290] ss:$8 sps:$4 sm:$0xff]  }
  0x91   :  { %1480 = vmatpush1.bf16.msra.mxu0 %v2233_v49  ;;  %842 = vmatprep.subr.bf16.mxu1 %v2238_v50  ;;  %v2329_v49 = vld [vmem:[#allocation3 + $0x290] ss:$8 sps:$4 sm:$0xff]   ;;  %v2334_v50 = vld [vmem:[#allocation6 + $0x2a4] ss:$8 sps:$4 sm:$0xff]  }
  0x92   :  { %1481 = vmatprep.subr.bf16.mxu0 %v2241_v51  ;;  %v2337_v51 = vld [vmem:[#allocation3 + $0x2a4] ss:$8 sps:$4 sm:$0xff]  }
  0x94   :  { %843 = vmatpush1.bf16.msra.mxu1 %v2236_v52  ;;  %v2332_v52 = vld [vmem:[#allocation6 + $0x2a0] ss:$8 sps:$4 sm:$0xff]  }
  0x95   :  { %1482 = vmatpush1.bf16.msra.mxu0 %v2239_v53  ;;  %844 = vmatprep.subr.bf16.mxu1 %v2244_v54  ;;  %v2335_v53 = vld [vmem:[#allocation3 + $0x2a0] ss:$8 sps:$4 sm:$0xff]   ;;  %v2340_v54 = vld [vmem:[#allocation6 + $0x2b4] ss:$8 sps:$4 sm:$0xff]  }
  0x96   :  { %1483 = vmatprep.subr.bf16.mxu0 %v2247_v55  ;;  %v2343_v55 = vld [vmem:[#allocation3 + $0x2b4] ss:$8 sps:$4 sm:$0xff]  }
  0x98   :  { %845 = vmatpush1.bf16.msra.mxu1 %v2242_v56  ;;  %v2338_v56 = vld [vmem:[#allocation6 + $0x2b0] ss:$8 sps:$4 sm:$0xff]  }
  0x99   :  { %1484 = vmatpush1.bf16.msra.mxu0 %v2245_v57  ;;  %846 = vmatprep.subr.bf16.mxu1 %v2250_v58  ;;  %v2341_v57 = vld [vmem:[#allocation3 + $0x2b0] ss:$8 sps:$4 sm:$0xff]   ;;  %v2346_v58 = vld [vmem:[#allocation6 + $0x2c4] ss:$8 sps:$4 sm:$0xff]  }
  0x9a   :  { %1485 = vmatprep.subr.bf16.mxu0 %v2253_v59  ;;  %v2349_v59 = vld [vmem:[#allocation3 + $0x2c4] ss:$8 sps:$4 sm:$0xff]  }
  0x9c   :  { %847 = vmatpush1.bf16.msra.mxu1 %v2248_v60  ;;  %v2344_v60 = vld [vmem:[#allocation6 + $0x2c0] ss:$8 sps:$4 sm:$0xff]  }
  0x9d   :  { %1486 = vmatpush1.bf16.msra.mxu0 %v2251_v61  ;;  %848 = vmatprep.subr.bf16.mxu1 %v2256_v62  ;;  %v2347_v61 = vld [vmem:[#allocation3 + $0x2c0] ss:$8 sps:$4 sm:$0xff]   ;;  %v2352_v62 = vld [vmem:[#allocation6 + $0x2d4] ss:$8 sps:$4 sm:$0xff]  }
  0x9e   :  { %1487 = vmatprep.subr.bf16.mxu0 %v2259_v63  ;;  %v2355_v63 = vld [vmem:[#allocation3 + $0x2d4] ss:$8 sps:$4 sm:$0xff]  }
  0xa0   :  { %849 = vmatpush1.bf16.msra.mxu1 %v2254_v0  ;;  %v2350_v0 = vld [vmem:[#allocation6 + $0x2d0] ss:$8 sps:$4 sm:$0xff]  }
  0xa1   :  { %1488 = vmatpush1.bf16.msra.mxu0 %v2257_v1  ;;  %850 = vmatprep.subr.bf16.mxu1 %v2262_v2  ;;  %v2353_v1 = vld [vmem:[#allocation3 + $0x2d0] ss:$8 sps:$4 sm:$0xff]   ;;  %v2358_v2 = vld [vmem:[#allocation6 + $0x2e4] ss:$8 sps:$4 sm:$0xff]  }
  0xa2   :  { %1489 = vmatprep.subr.bf16.mxu0 %v2265_v3  ;;  %v2361_v3 = vld [vmem:[#allocation3 + $0x2e4] ss:$8 sps:$4 sm:$0xff]  }
  0xa4   :  { %851 = vmatpush1.bf16.msra.mxu1 %v2260_v4  ;;  %v2356_v4 = vld [vmem:[#allocation6 + $0x2e0] ss:$8 sps:$4 sm:$0xff]  }
  0xa5   :  { %1490 = vmatpush1.bf16.msra.mxu0 %v2263_v5  ;;  %863 = vmatprep.subr.bf16.mxu1 %v2271_v6  ;;  %v2359_v5 = vld [vmem:[#allocation3 + $0x2e0] ss:$8 sps:$4 sm:$0xff]   ;;  %v2364_v6 = vld [vmem:[#allocation6 + $0x2f4] ss:$8 sps:$4 sm:$0xff]  }
  0xa6   :  { %1502 = vmatprep.subr.bf16.mxu0 %v2277_v7  ;;  %v2367_v7 = vld [vmem:[#allocation3 + $0x2f4] ss:$8 sps:$4 sm:$0xff]  }
  0xa7   :  { %853 = vmatmul.mubr.bf16.vlgmr.msra.gmra.mrb[0].mxu1 %v2266_v8  ;;  %v2362_v8 = vld [vmem:[#allocation6 + $0x2f0] ss:$8 sps:$4 sm:$0xff]  }
  0xa8   :  { %1492 = vmatmul.mubr.bf16.vlgmr.msra.gmra.mrb[0].mxu0 %v2272_v10  ;;  %864 = vmatpush1.bf16.msra.mxu1 %v2269_v9  ;;  %v2365_v9 = vld [vmem:[#allocation3 + $0x2f0] ss:$8 sps:$4 sm:$0xff]   ;;  %v2374_v10 = vld [vmem:[%s2660_s5 + $0x40] sm:$0xff]  }
  0xa9   :  { %1503 = vmatpush1.bf16.msra.mxu0 %v2275_v11  ;;  %865 = vmatprep.subr.bf16.mxu1 %v2280_v12  ;;  %v2368_v11 = vld [vmem:[%s2656_s1 + $0x10] ss:$24 sps:$4 sm:$0xff]  }
  0xaa   :  { %1504 = vmatprep.subr.bf16.mxu0 %v2283_v13  ;;  %895 = vmatprep.mubr.bf16.mxu1 %v2370_v19  ;;  %v2371_v12 = vld [vmem:[%s2655_s0 + $0x10] ss:$24 sps:$4 sm:$0xff]   ;;  %v2375_v13 = vld [vmem:[%s2660_s5] sm:$0xff]   ;;  %v2381_v19 = vld [vmem:[%s2660_s5 + $0x18] sm:$0xff]  }
  0xab   :  { %1534 = vmatprep.mubr.bf16.mxu0 %v2373_v21  ;;  %v2383_v21 = vld [vmem:[%s2660_s5 + $0x20] sm:$0xff]  }
  0xac   :  { %866 = vmatpush1.bf16.msra.mxu1 %v2278_v14  ;;  %v2376_v14 = vld [vmem:[%s2660_s5 + $0x48] sm:$0xff]  }
  0xad   :  { %1505 = vmatpush1.bf16.msra.mxu0 %v2281_v15  ;;  %867 = vmatprep.subr.bf16.mxu1 %v2286_v16  ;;  %v2377_v15 = vld [vmem:[%s2660_s5 + $0x8] sm:$0xff]   ;;  %v2378_v16 = vld [vmem:[%s2660_s5 + $0x50] sm:$0xff]  }
  0xae   :  { %1506 = vmatprep.subr.bf16.mxu0 %v2289_v17  ;;  %v2379_v17 = vld [vmem:[%s2660_s5 + $0x10] sm:$0xff]  }
  0xb0   :  { %868 = vmatpush1.bf16.msra.mxu1 %v2284_v18  ;;  %v2380_v18 = vld [vmem:[%s2660_s5 + $0x58] sm:$0xff]  }
  0xb1   :  { %1507 = vmatpush1.bf16.msra.mxu0 %v2287_v20  ;;  %869 = vmatprep.subr.bf16.mxu1 %v2292_v22  ;;  %v2382_v20 = vld [vmem:[%s2660_s5 + $0x60] sm:$0xff]   ;;  %v2384_v22 = vld [vmem:[%s2660_s5 + $0x68] sm:$0xff]  }
  0xb2   :  { %1508 = vmatprep.subr.bf16.mxu0 %v2295_v23  ;;  %v2385_v23 = vld [vmem:[%s2660_s5 + $0x28] sm:$0xff]  }
  0xb4   :  { %870 = vmatpush1.bf16.msra.mxu1 %v2290_v24  ;;  %v2386_v24 = vld [vmem:[%s2660_s5 + $0x70] sm:$0xff]  }
  0xb5   :  { %1509 = vmatpush1.bf16.msra.mxu0 %v2293_v25  ;;  %871 = vmatprep.subr.bf16.mxu1 %v2298_v26  ;;  %v2387_v25 = vld [vmem:[%s2660_s5 + $0x30] sm:$0xff]   ;;  %v2388_v26 = vld [vmem:[%s2660_s5 + $0x78] sm:$0xff]  }
  0xb6   :  { %1510 = vmatprep.subr.bf16.mxu0 %v2301_v27  ;;  %v2389_v27 = vld [vmem:[%s2660_s5 + $0x38] sm:$0xff]  }
  0xb8   :  { %872 = vmatpush1.bf16.msra.mxu1 %v2296_v28  ;;  %v1547_v28 = vlaneseq }
  0xb9   :  { %1511 = vmatpush1.bf16.msra.mxu0 %v2299_v29  ;;  %873 = vmatprep.subr.bf16.mxu1 %v2304_v30 }
  0xba   :  { %1512 = vmatprep.subr.bf16.mxu0 %v2307_v31  ;;  %v2625_v29 = vshrl.u32 %v1547_v28, 7  ;;  %v1545_v31 = vld [vmem:[%s2659_s4] sm:$0x3] }
  0xbc   :  { %874 = vmatpush1.bf16.msra.mxu1 %v2302_v32  ;;  %v1549_v30 = vsub.s32 0, %v2625_v29  ;;  %v1553_v32 = vsub.s32 1, %v2625_v29 }
  0xbd   :  { %1513 = vmatpush1.bf16.msra.mxu0 %v2305_v33  ;;  %875 = vmatprep.subr.bf16.mxu1 %v2310_v34 }
  0xbe   :  { %1514 = vmatprep.subr.bf16.mxu0 %v2313_v35  ;;  %v1550_v33 = vrot.slane %v1545_v31, %v1549_v30 }
  0xc0   :  { %876 = vmatpush1.bf16.msra.mxu1 %v2308_v36  ;;  %v1554_v36 = vrot.slane %v1545_v31, %v1553_v32 }
  0xc1   :  { %1515 = vmatpush1.bf16.msra.mxu0 %v2311_v37  ;;  %877 = vmatprep.subr.bf16.mxu1 %v2316_v38 }
  0xc2   :  { %1516 = vmatprep.subr.bf16.mxu0 %v2319_v39 }
  0xc4   :  { %878 = vmatpush1.bf16.msra.mxu1 %v2314_v40 }
  0xc5   :  { %1517 = vmatpush1.bf16.msra.mxu0 %v2317_v41  ;;  %879 = vmatprep.subr.bf16.mxu1 %v2322_v42 }
  0xc6   :  { %1518 = vmatprep.subr.bf16.mxu0 %v2325_v43 }
  0xc8   :  { %880 = vmatpush1.bf16.msra.mxu1 %v2320_v44 }
  0xc9   :  { %1519 = vmatpush1.bf16.msra.mxu0 %v2323_v45  ;;  %881 = vmatprep.subr.bf16.mxu1 %v2328_v46 }
  0xca   :  { %1520 = vmatprep.subr.bf16.mxu0 %v2331_v47 }
  0xcc   :  { %882 = vmatpush1.bf16.msra.mxu1 %v2326_v48 }
  0xcd   :  { %1521 = vmatpush1.bf16.msra.mxu0 %v2329_v49  ;;  %883 = vmatprep.subr.bf16.mxu1 %v2334_v50 }
  0xce   :  { %1522 = vmatprep.subr.bf16.mxu0 %v2337_v51 }
  0xd0   :  { %884 = vmatpush1.bf16.msra.mxu1 %v2332_v52 }
  0xd1   :  { %1523 = vmatpush1.bf16.msra.mxu0 %v2335_v53  ;;  %885 = vmatprep.subr.bf16.mxu1 %v2340_v54 }
  0xd2   :  { %1524 = vmatprep.subr.bf16.mxu0 %v2343_v55 }
  0xd4   :  { %886 = vmatpush1.bf16.msra.mxu1 %v2338_v56 }
  0xd5   :  { %1525 = vmatpush1.bf16.msra.mxu0 %v2341_v57  ;;  %887 = vmatprep.subr.bf16.mxu1 %v2346_v58  ;;  %v2003_v58 = vld [vmem:[%s2661_s6] ss:$0 sm:$0xff] }
  0xd6   :  { %1526 = vmatprep.subr.bf16.mxu0 %v2349_v59 }
  0xd8   :  { %888 = vmatpush1.bf16.msra.mxu1 %v2344_v60 }
  0xd9   :  { %1527 = vmatpush1.bf16.msra.mxu0 %v2347_v61  ;;  %889 = vmatprep.subr.bf16.mxu1 %v2352_v62 }
  0xda   :  { %1528 = vmatprep.subr.bf16.mxu0 %v2355_v63 }
  0xdc   :  { %890 = vmatpush1.bf16.msra.mxu1 %v2350_v0 }
  0xdd   :  { %1529 = vmatpush1.bf16.msra.mxu0 %v2353_v1  ;;  %891 = vmatprep.subr.bf16.mxu1 %v2358_v2  ;;  %v2020_v1 = vld [vmem:[%s2662_s7] ss:$0 sm:$0xff]  ;;  %s2466_s7 = smov [#allocation8]  }
  0xde   :  { %1530 = vmatprep.subr.bf16.mxu0 %v2361_v3  ;;  %s1789_s23 = sshll.u32 %s2466_s7, 4  ;;  %s1790_s23 = int_to_ptr.vmem [resolvable:$true] %s1789_s23 }
  0xdf   :  { %s2434_s24 = scalar_lea.vmem %s1790_s23, 16  ;;  %p2439_p3 = scmp.lt.s32.totalorder %s1790_s23, %s1790_s23 }
  0xe0   :  { %892 = vmatpush1.bf16.msra.mxu1 %v2356_v4  ;;  %p2435_p2 = scmp.ne.s32.totalorder %s1790_s23, %s2434_s24 }
  0xe1   :  { %1531 = vmatpush1.bf16.msra.mxu0 %v2359_v5  ;;  %893 = vmatprep.subr.bf16.mxu1 %v2364_v6 }
  0xe2   :  { %1532 = vmatprep.subr.bf16.mxu0 %v2367_v7 }
  0xe4   :  { %894 = vmatpush1.bf16.msra.mxu1 %v2362_v8 }
  0xe5   :  { %1533 = vmatpush1.bf16.msra.mxu0 %v2365_v9  ;;  %2021 = vmatprep.subr.bf16.mxu1 %v2374_v10  ;;  %v1768_v9 = vand.u32 127, %v1547_v28 }
  0xe7   :  { %896 = vmatmul.mubr.bf16.vlgmr.msra.gmra.mrb[0].mxu1 %v2368_v11  ;;  %v1773_v10 = vadd.s32 4294967288, %v1768_v9  ;;  %v1762_v11 = vstv %s2663_s8  ;;  %s2438_s8 = scalar_lea.vmem %s1790_s23, 32 }
  0xe8   :  { %1535 = vmatmul.mubr.bf16.vlgmr.msra.gmra.mrb[0].mxu0 %v2371_v12  ;;  %2022 = vmatpush3.bf16.msra.mxu1 %v2375_v13  ;;  %v1771_v13 = vsub.s32 %v1768_v9, %v2625_v29  ;;  %p2440_p4 = scmp.lt.s32.totalorder %s2438_s8, %s2434_s24 }
  0xe9   :  { %2023 = vmatprep.subr.bf16.mxu1 %v2376_v14 }
  0xea   :  { %p2441_p5 = por %p2440_p4, %p2439_p3 }
  0xec   :  { %2024 = vmatpush3.bf16.msra.mxu1 %v2377_v15  ;;  %v1776_v15 = vsub.s32 %v1773_v10, %v2625_v29  ;;  %p2442_p6 = pnand %p2441_p5, %p2435_p2 }
  0xed   :  { %2025 = vmatprep.subr.bf16.mxu1 %v2378_v16 }
  0xf0   :  { %2026 = vmatpush3.bf16.msra.mxu1 %v2379_v17 }
  0xf1   :  { %2027 = vmatprep.subr.bf16.mxu1 %v2380_v18 }
  0xf4   :  { %2028 = vmatpush3.bf16.msra.mxu1 %v2381_v19 }
  0xf5   :  { %2029 = vmatprep.subr.bf16.mxu1 %v2382_v20 }
  0xf8   :  { %2030 = vmatpush3.bf16.msra.mxu1 %v2383_v21 }
  0xf9   :  { %2031 = vmatprep.subr.bf16.mxu1 %v2384_v22 }
  0xfc   :  { %2032 = vmatpush3.bf16.msra.mxu1 %v2385_v23 }
  0xfd   :  { %2033 = vmatprep.subr.bf16.mxu1 %v2386_v24 }
 0x100   :  { %2034 = vmatpush3.bf16.msra.mxu1 %v2387_v25 }
 0x101   :  { %2035 = vmatprep.subr.bf16.mxu1 %v2388_v26 }
 0x104   :  { %2036 = vmatpush3.bf16.msra.mxu1 %v2389_v27 }
 0x1ba   :  { %v897_v34 = vpop.f32.mrb[0].mxu1 }
 0x1bb   :  { %v1536_v35 = vpop.f32.mrb[0].mxu0  ;;  %v899_v38 = vpop.f32.mrb[1].mxu1 }
 0x1bc   :  { %v2043_v37 = vadd.f32 %v1536_v35, %v897_v34  ;;  %v1538_v39 = vpop.f32.mrb[1].mxu0  ;;  %v901_v41 = vpop.f32.mrb[2].mxu1 }
 0x1bd   :  { %v2044_v40 = vadd.f32 %v1538_v39, %v899_v38  ;;  %v1540_v42 = vpop.f32.mrb[2].mxu0  ;;  %v903_v45 = vpop.f32.mrb[3].mxu1 }
 0x1be   :  { %v1557_v43 = vadd.f32 %v2043_v37, %v1550_v33  ;;  %v2045_v44 = vadd.f32 %v1540_v42, %v901_v41  ;;  %v1542_v46 = vpop.f32.mrb[3].mxu0 }
 0x1bf   :  { %v1558_v47 = vadd.f32 %v2044_v40, %v1554_v36  ;;  %v2046_v48 = vadd.f32 %v1542_v46, %v903_v45 }
 0x1c0   :  { %v1559_v49 = vadd.f32 %v2045_v44, %v1550_v33  ;;  %v1561_v51 = vmax.f32 %v1557_v43, 0.0 }
 0x1c1   :  { %v1560_v50 = vadd.f32 %v2046_v48, %v1554_v36  ;;  %v1562_v53 = vmax.f32 %v1558_v47, 0.0 }
 0x1c2   :  { %v1563_v52 = vmax.f32 %v1559_v49, 0.0 }
 0x1c3   :  { %v1564_v54 = vmax.f32 %v1560_v50, 0.0 }
 0x1c4   :  { %v1565_v55 = vpack.c.bf16 %v1563_v52, %v1561_v51 }
 0x1c5   :  { %v1566_v56 = vpack.c.bf16 %v1564_v54, %v1562_v53 }
 0x1c7   :  { %1734 = vmatprep.mubr.bf16.mxu1 %v1566_v56 }
 0x1c8   :  { %1735 = vmatmul.mubr.bf16.vlgmr.msra.gmra.mrb[4].mxu1 %v1565_v55 }
 0x29b   :  { %v2037_v57 = vpop.f32.mrb[4].mxu1 }
 0x29c   :  { %v2038_v59 = vpop.f32.mrb[5].mxu1 }
 0x29d   :  { %v2039_v60 = vadd.f32 %v2038_v59, %v2037_v57  ;;  %v2040_v61 = vpop.f32.mrb[6].mxu1 }
 0x29e   :  { %v2041_v62 = vpop.f32.mrb[7].mxu1 }
 0x29f   :  { %v1737_v63 = vadd.f32 %v2039_v60, %v2003_v58  ;;  %v2042_v0 = vadd.f32 %v2041_v62, %v2040_v61 }
 0x2a1   :  { %v1743_v2 = vmax.f32 %v1737_v63, 0.0  ;;  %v1740_v3 = vadd.f32 %v2042_v0, %v2003_v58 }
 0x2a3   :  { %v1744_v4 = vmax.f32 %v1740_v3, 0.0  ;;  %v1752_v5 = vmul.f32 %v2020_v1, %v1743_v2 }
 0x2a5   :  { %v1755_v6 = vsel %vm1754_vm0, %v1752_v5, 0.0  ;;  %v1753_v7 = vmul.f32 %v2020_v1, %v1744_v4 }
 0x2a6   :  { %1756 = vadd.xlane.f32.xlu0 %v1755_v6 }
 0x2a7   :  { %v1758_v8 = vsel %vm1754_vm0, %v1753_v7, 0.0 }
 0x2aa   :  { %1759 = vadd.xlane.f32.xlu0 %v1758_v8 }
 0x333   :  { %v1757_v12 = vpop.xlane.xlu0 %1756 }
 0x334   :  { %v1763_v14 = vadd.f32 %v1762_v11, %v1757_v12 }
 0x336   :  { %v1772_v18 = vrot.slane %v1763_v14, %v1771_v13 }
 0x337   :  { %v1760_v16 = vpop.xlane.xlu0 %1759 }
 0x338   :  { %v1764_v17 = vadd.f32 %v1762_v11, %v1760_v16 }
 0x33a   :  { %v1777_v19 = vrot.slane %v1764_v17, %v1776_v15 }
 0x33c   :  { %v1779_v20 = vsel %vm1778_vm1, %v1777_v19, %v1772_v18 }
 0x33d   :  { %1782 = vst.msk [vmem:[#allocation8] sm:$0x1] %vm1781_vm2, %v1779_v20 }
 0x33e   :  { %2445 = shalt.err (!%p2442_p6)
}
 0x33f   :  { %s2446_s27 = scalar_lea.hbm %s2664_s9, 16 }
 0x340   :  { %p2447_p7 = scmp.ne.s32.totalorder %s2664_s9, %s2446_s27  ;;  %p2450_p8 = scmp.lt.u32.totalorder %s2446_s27, %s2664_s9 }
 0x342   :  { %p2452_p9 = pnand %p2450_p8, %p2447_p7 }
 0x344   :  { %2455 = shalt.err (!%p2452_p9)
}
 0x345   :  { %1792 = dma.vmem_to_hbm [thread:$0]  %s1790_s23, 16, %s2664_s9, [#allocation5]  }
 0x346   :  { %2460 = dma.done.wait [#allocation5], 16  }
 0x347   :  { %2461 = vsyncadd [#allocation5], 4294967280 }
 0x348   :  { %1796 = vsyncpa [#allocation4], 1 }
 0x349   :  { %1797 = vsyncpa [#allocation7], 1 }
 0x34a   :  { %1798 = vsyncpa [#allocation5], 1 }

</bundles_post_ra>
